<compile_context>
chip_gen: v7x
topology: tpu7x:2x2x1
jax: 0.10.0
libtpu: 0.0.40
codegen_flags: <defaults>
</compile_context>

<pallas_src>
import jax
import jax.numpy as jnp
from jax.experimental import pallas as pl
from jax.experimental.pallas import tpu as pltpu

ATT_W = 128   # lane-padded width for attention scores / probs
GATE_W = 128  # lane-padded width of the copy_or_gen block in the fused weight


def _softmax(z):
    # Exact softmax (torch.nn.Softmax semantics).  Do NOT use approx
    # reciprocal here: distributions must sum to 1 to float precision.
    m = jnp.max(z, axis=-1, keepdims=True)
    e = jnp.exp(z - m)
    return e / jnp.sum(e, axis=-1, keepdims=True)


def _ptrgen_kernel(x_ref, attn_ref, act_ref, amask_ref, iam_ref, w_ref, b_ref,
                   out_ref, gen_ref, small_ref):
    B = x_ref.shape[0]
    S = act_ref.shape[1]
    OUTV = amask_ref.shape[1]
    gate_w = w_ref.shape[1] - OUTV
    neg_inf = jnp.float32(-jnp.inf)

    amask = amask_ref[...]                                    # [B, OUTV]

    # ---- one fused MXU matmul for both linear heads (bf16 in, f32 acc) ------
    logits = jnp.dot(x_ref[...], w_ref[...],
                     preferred_element_type=jnp.float32) + b_ref[...]
    gen_logits = logits[:, :OUTV]                             # [B, OUTV]
    gate_block = logits[:, OUTV:OUTV + gate_w]                # [B, 128], lanes 0,1 real

    # ---- generation head: + log(actionmask) + softmax ------------------------
    # NOTE: an all-zero actionmask row gives NaN, same as the torch reference.
    gen = _softmax(jnp.where(amask > 0.0, gen_logits, neg_inf))

    # ---- copy_or_gen gate: mask column 1 by cancopy, padding lanes by -inf ---
    cancopy = jnp.sum(iam_ref[...] * amask, axis=-1, keepdims=True) > 0.0  # [B,1]
    limit = 1 + cancopy.astype(jnp.int32)                     # keep lane 0, lane 1 iff cancopy
    gcol = jax.lax.broadcasted_iota(jnp.int32, (B, gate_w), 1)
    pg_block = _softmax(jnp.where(gcol < limit, gate_block, neg_inf))  # [B,128]

    # ---- attention probabilities (padding lanes carry -1e30 -> prob 0) -------
    attnp = _softmax(attn_ref[...])                           # [B, 128]

    # ---- pointer distribution: scatter-add attn mass directly over OUTV lanes
    ocol = jax.lax.broadcasted_iota(jnp.int32, (B, OUTV), 1)
    act = act_ref[...]                                        # [B, S] int32
    accs = [jnp.zeros((B, OUTV), jnp.float32) for _ in range(4)]
    for s in range(S):                                        # S small & static
        accs[s % 4] = accs[s % 4] + jnp.where(
            ocol == act[:, s:s + 1], attnp[:, s:s + 1], 0.0)
    ptr = (accs[0] + accs[1]) + (accs[2] + accs[3])           # [B, OUTV]

    # ---- mixture --------------------------------------------------------------
    out = pg_block[:, 0:1] * gen + pg_block[:, 1:2] * ptr

    out_ref[...] = out
    gen_ref[...] = gen
    # lane-dense slab: lanes [0:2] = ptr_or_gen probs, lanes [128:128+S] = attn probs
    small_ref[...] = jnp.concatenate([pg_block, attnp], axis=-1)


@jax.jit
def ptrgen_forward(x, attn_scores, act_ids, actionmask, inp_actmask,
                   w_fused, b_fused):
    B, H = x.shape
    S = attn_scores.shape[1]
    OUTV = actionmask.shape[1]
    NF = w_fused.shape[1]
    assert S <= ATT_W and NF == OUTV + GATE_W

    BB = 8 if B % 8 == 0 else B
    grid = (B // BB,)

    xb = x.astype(jnp.bfloat16)
    attn_pad = jnp.pad(attn_scores.astype(jnp.float32),
                       ((0, 0), (0, ATT_W - S)), constant_values=-1e30)

    def rowspec(shape):
        return pl.BlockSpec(shape, lambda i: (i, 0))

    def fullspec(shape):
        return pl.BlockSpec(shape, lambda i: (0, 0))

    out, gen, small = pl.pallas_call(
        _ptrgen_kernel,
        grid=grid,
        in_specs=[rowspec((BB, H)),
                  rowspec((BB, ATT_W)),
                  rowspec((BB, S)),
                  rowspec((BB, OUTV)),
                  fullspec((1, OUTV)),
                  fullspec((H, NF)),
                  fullspec((1, NF))],
        out_specs=(rowspec((BB, OUTV)),
                   rowspec((BB, OUTV)),
                   rowspec((BB, GATE_W + ATT_W))),
        out_shape=(jax.ShapeDtypeStruct((B, OUTV), jnp.float32),
                   jax.ShapeDtypeStruct((B, OUTV), jnp.float32),
                   jax.ShapeDtypeStruct((B, GATE_W + ATT_W), jnp.float32)),
        compiler_params=pltpu.CompilerParams(
            dimension_semantics=("parallel",)),
    )(xb, attn_pad, act_ids, actionmask, inp_actmask, w_fused, b_fused)

    ptr_or_gen_probs = small[:, 0:2]
    attn_probs = small[:, GATE_W:GATE_W + S]
    return out, ptr_or_gen_probs, gen, attn_probs


def ptrgen_reference(x, attn_scores, ctx_ids, actionmask, inp_actmask,
                     inp_to_act, w_gen_t, b_gen_t, w_cg_t, b_cg_t, out_map):
    """Pure-JAX port of the torch eval-mode forward (bf16 linears like kernel)."""
    xb = x.astype(jnp.bfloat16)
    B = x.shape[0]
    INPV = inp_to_act.shape[0]
    OUTV = actionmask.shape[1]

    pg_logits = jnp.dot(xb, w_cg_t.T.astype(jnp.bfloat16),
                        preferred_element_type=jnp.float32) + b_cg_t[None, :]
    cancopy = (jnp.sum(inp_actmask[None, :] * actionmask, axis=1) > 0)
    cancopy_mask = jnp.stack(
        [jnp.ones_like(cancopy), cancopy], axis=1).astype(jnp.float32)
    pg = jax.nn.softmax(pg_logits + jnp.log(cancopy_mask), axis=-1)

    gen_logits = jnp.dot(xb, w_gen_t.T.astype(jnp.bfloat16),
                         preferred_element_type=jnp.float32) + b_gen_t[None, :]
    gen_logits = gen_logits[:, out_map]
    gen = jax.nn.softmax(gen_logits + jnp.log(actionmask), axis=-1)

    attn_probs = jax.nn.softmax(attn_scores.astype(jnp.float32), axis=-1)

    inpdist = jnp.zeros((B, INPV), jnp.float32).at[
        jnp.arange(B)[:, None], ctx_ids].add(attn_probs)
    ptr = jnp.zeros((B, OUTV), jnp.float32).at[:, inp_to_act].set(inpdist)

    out = pg[:, 0:1] * gen + pg[:, 1:2] * ptr
    return out, pg, gen, attn_probs


if __name__ == "__main__":
    B, H, S = 8, 32, 16
    INPV, OUTV = 32, 128

    key = jax.random.PRNGKey(0)
    ks = jax.random.split(key, 8)

    # ---- parameters (deterministic init; torch Linear layout is [out, in]) ----
    w_gen_t = jax.random.normal(ks[0], (OUTV, H), jnp.float32) * 0.1
    b_gen_t = jax.random.normal(ks[1], (OUTV,), jnp.float32) * 0.1
    w_cg_t = jax.random.normal(ks[2], (2, H), jnp.float32) * 0.1
    b_cg_t = jax.random.normal(ks[3], (2,), jnp.float32) * 0.1

    # _inp_to_act buffer: injective input-vocab-id -> out-vocab-id copy map
    inp_to_act = (jnp.arange(INPV, dtype=jnp.int32) * 2 + 3) % OUTV
    inp_actmask = jnp.zeros((OUTV,), jnp.float32).at[inp_to_act].set(1.0)

    # out_map buffer: remap rare out ids to id 1; applied by gathering gen_lin
    # columns (index_select after a Linear == Linear with gathered weights).
    rare_ids = jnp.array([5, 17, 40], dtype=jnp.int32)
    out_map = jnp.arange(OUTV, dtype=jnp.int32).at[rare_ids].set(1)
    w_gen_eff = w_gen_t[out_map].T               # [H, OUTV]
    b_gen_eff = b_gen_t[out_map][None, :]        # [1, OUTV]
    w_cg_eff = w_cg_t.T                          # [H, 2]
    b_cg_eff = b_cg_t[None, :]                   # [1, 2]

    # fused weight: [gen columns | gate columns | zero padding to 128 lanes]
    w_fused = jnp.concatenate(
        [w_gen_eff, w_cg_eff, jnp.zeros((H, GATE_W - 2), jnp.float32)],
        axis=1).astype(jnp.bfloat16)             # [H, OUTV + 128] bf16
    b_fused = jnp.concatenate(
        [b_gen_eff, b_cg_eff, jnp.zeros((1, GATE_W - 2), jnp.float32)],
        axis=1)                                  # [1, OUTV + 128] f32

    # ---- forward inputs -------------------------------------------------------
    x = jax.random.normal(ks[4], (B, H), jnp.float32)
    attn_scores = jax.random.normal(ks[5], (B, S), jnp.float32)
    ctx_ids = jax.random.randint(ks[6], (B, S), 0, INPV, dtype=jnp.int32)
    act_ids = inp_to_act[ctx_ids]                # [B, S] pre-mapped copy targets
    actionmask = jax.random.bernoulli(ks[7], 0.4, (B, OUTV)).astype(jnp.float32)
    actionmask = actionmask.at[:, 0].set(1.0)    # ensure >=1 valid action per row

    outs = ptrgen_forward(x, attn_scores, act_ids, actionmask,
                          inp_actmask[None, :], w_fused, b_fused)
    out_probs, ptr_or_gen_probs, gen_probs, attn_probs = jax.block_until_ready(outs)

    # ---- sanity: every returned distribution is a proper distribution --------
    assert jnp.allclose(jnp.sum(ptr_or_gen_probs, -1), 1.0, atol=1e-3)
    assert jnp.allclose(jnp.sum(gen_probs, -1), 1.0, atol=1e-3)
    assert jnp.allclose(jnp.sum(attn_probs, -1), 1.0, atol=1e-3)
    assert jnp.allclose(jnp.sum(out_probs, -1), 1.0, atol=1e-3)
    assert bool(jnp.all(jnp.isfinite(out_probs)))

    # ---- reference check vs. pure-JAX port of the torch forward --------------
    r_out, r_pg, r_gen, r_attn = ptrgen_reference(
        x, attn_scores, ctx_ids, actionmask, inp_actmask,
        inp_to_act, w_gen_t, b_gen_t, w_cg_t, b_cg_t, out_map)
    assert jnp.allclose(ptr_or_gen_probs, r_pg, atol=2e-3, rtol=2e-3)
    assert jnp.allclose(gen_probs, r_gen, atol=2e-3, rtol=2e-3)
    assert jnp.allclose(attn_probs, r_attn, atol=2e-3, rtol=2e-3)
    assert jnp.allclose(out_probs, r_out, atol=2e-3, rtol=2e-3)

    print("KERNEL_OK")
</pallas_src>

<mosaic_0001>
module attributes {stable_mosaic.version = 11 : i64} {
  func.func @_ptrgen_kernel(%arg0: i32, %arg1: memref<8x32xbf16, #tpu.memory_space<vmem>>, %arg2: memref<8x128xf32, #tpu.memory_space<vmem>>, %arg3: memref<8x16xi32, #tpu.memory_space<vmem>>, %arg4: memref<8x128xf32, #tpu.memory_space<vmem>>, %arg5: memref<1x128xf32, #tpu.memory_space<vmem>>, %arg6: memref<32x256xbf16, #tpu.memory_space<vmem>>, %arg7: memref<1x256xf32, #tpu.memory_space<vmem>>, %arg8: memref<8x128xf32, #tpu.memory_space<vmem>>, %arg9: memref<8x128xf32, #tpu.memory_space<vmem>>, %arg10: memref<8x256xf32, #tpu.memory_space<vmem>>) attributes {dimension_semantics = [#tpu.dimension_semantics<parallel>], iteration_bounds = array<i64: 1>, scalar_prefetch = 0 : i64, scratch_operands = 0 : i64, tpu.core_type = #tpu.core_type<tc>, window_params = [{transform_indices = @transform_0, window_bounds = array<i64: 8, 32>}, {transform_indices = @transform_1, window_bounds = array<i64: 8, 128>}, {transform_indices = @transform_2, window_bounds = array<i64: 8, 16>}, {transform_indices = @transform_3, window_bounds = array<i64: 8, 128>}, {pipeline_mode = #tpu.pipeline_mode<synchronous>, transform_indices = @transform_4, window_bounds = array<i64: 1, 128>}, {pipeline_mode = #tpu.pipeline_mode<synchronous>, transform_indices = @transform_5, window_bounds = array<i64: 32, 256>}, {pipeline_mode = #tpu.pipeline_mode<synchronous>, transform_indices = @transform_6, window_bounds = array<i64: 1, 256>}, {transform_indices = @transform_7, window_bounds = array<i64: 8, 128>}, {transform_indices = @transform_8, window_bounds = array<i64: 8, 128>}, {transform_indices = @transform_9, window_bounds = array<i64: 8, 256>}]} {
    %c0 = arith.constant 0 : index
    %c0_0 = arith.constant 0 : index
    %0 = vector.load %arg4[%c0, %c0_0] : memref<8x128xf32, #tpu.memory_space<vmem>>, vector<8x128xf32>
    %c0_1 = arith.constant 0 : index
    %c0_2 = arith.constant 0 : index
    %1 = vector.load %arg1[%c0_1, %c0_2] : memref<8x32xbf16, #tpu.memory_space<vmem>>, vector<8x32xbf16>
    %c0_3 = arith.constant 0 : index
    %c0_4 = arith.constant 0 : index
    %2 = vector.load %arg6[%c0_3, %c0_4] : memref<32x256xbf16, #tpu.memory_space<vmem>>, vector<32x256xbf16>
    %cst = arith.constant dense<0.000000e+00> : vector<8x256xf32>
    %3 = tpu.matmul %1, %2, %cst {dimension_numbers = #tpu.dot_dimension_numbers<[1], [0], [0], [1], [0, 0, 1, 1], [], []>} : vector<8x32xbf16>, vector<32x256xbf16>, vector<8x256xf32> -> vector<8x256xf32>
    %c0_5 = arith.constant 0 : index
    %c0_6 = arith.constant 0 : index
    %4 = vector.load %arg7[%c0_5, %c0_6] : memref<1x256xf32, #tpu.memory_space<vmem>>, vector<1x256xf32>
    %5 = vector.broadcast %4 : vector<1x256xf32> to vector<8x256xf32>
    %6 = arith.addf %3, %5 : vector<8x256xf32>
    %7 = vector.extract_strided_slice %6 {offsets = [0, 0], sizes = [8, 128], strides = [1, 1]} : vector<8x256xf32> to vector<8x128xf32>
    %8 = vector.extract_strided_slice %6 {offsets = [0, 128], sizes = [8, 128], strides = [1, 1]} : vector<8x256xf32> to vector<8x128xf32>
    %cst_7 = arith.constant 0.000000e+00 : f32
    %9 = vector.broadcast %cst_7 : f32 to vector<8x128xf32>
    %10 = arith.cmpf ogt, %0, %9 : vector<8x128xf32>
    %cst_8 = arith.constant 0xFF800000 : f32
    %11 = vector.broadcast %cst_8 : f32 to vector<8x128xf32>
    %12 = arith.select %10, %7, %11 : vector<8x128xi1>, vector<8x128xf32>
    %cst_9 = arith.constant dense<0xFF800000> : vector<8xf32>
    %13 = vector.multi_reduction <maximumf>, %12, %cst_9 [1] : vector<8x128xf32> to vector<8xf32>
    %14 = vector.shape_cast %13 : vector<8xf32> to vector<8x1xf32>
    %15 = vector.broadcast %14 : vector<8x1xf32> to vector<8x128xf32>
    %16 = arith.subf %12, %15 : vector<8x128xf32>
    %17 = math.exp %16 : vector<8x128xf32>
    %cst_10 = arith.constant dense<0.000000e+00> : vector<8xf32>
    %18 = vector.multi_reduction <add>, %17, %cst_10 [1] : vector<8x128xf32> to vector<8xf32>
    %19 = vector.shape_cast %18 : vector<8xf32> to vector<8x1xf32>
    %20 = vector.broadcast %19 : vector<8x1xf32> to vector<8x128xf32>
    %21 = arith.divf %17, %20 : vector<8x128xf32>
    %c0_11 = arith.constant 0 : index
    %c0_12 = arith.constant 0 : index
    %22 = vector.load %arg5[%c0_11, %c0_12] : memref<1x128xf32, #tpu.memory_space<vmem>>, vector<1x128xf32>
    %23 = vector.broadcast %22 : vector<1x128xf32> to vector<8x128xf32>
    %24 = arith.mulf %23, %0 : vector<8x128xf32>
    %cst_13 = arith.constant dense<0.000000e+00> : vector<8xf32>
    %25 = vector.multi_reduction <add>, %24, %cst_13 [1] : vector<8x128xf32> to vector<8xf32>
    %26 = vector.shape_cast %25 : vector<8xf32> to vector<8x1xf32>
    %cst_14 = arith.constant 0.000000e+00 : f32
    %27 = vector.broadcast %cst_14 : f32 to vector<8x1xf32>
    %28 = arith.cmpf ogt, %26, %27 : vector<8x1xf32>
    %29 = arith.extui %28 : vector<8x1xi1> to vector<8x1xi32>
    %c1_i32 = arith.constant 1 : i32
    %30 = vector.broadcast %c1_i32 : i32 to vector<8x1xi32>
    %31 = arith.addi %30, %29 : vector<8x1xi32>
    %32 = tpu.iota {dimensions = array<i32: 1>} : vector<8x128xi32>
    %33 = vector.broadcast %31 : vector<8x1xi32> to vector<8x128xi32>
    %34 = arith.cmpi slt, %32, %33 : vector<8x128xi32>
    %cst_15 = arith.constant 0xFF800000 : f32
    %35 = vector.broadcast %cst_15 : f32 to vector<8x128xf32>
    %36 = arith.select %34, %8, %35 : vector<8x128xi1>, vector<8x128xf32>
    %cst_16 = arith.constant dense<0xFF800000> : vector<8xf32>
    %37 = vector.multi_reduction <maximumf>, %36, %cst_16 [1] : vector<8x128xf32> to vector<8xf32>
    %38 = vector.shape_cast %37 : vector<8xf32> to vector<8x1xf32>
    %39 = vector.broadcast %38 : vector<8x1xf32> to vector<8x128xf32>
    %40 = arith.subf %36, %39 : vector<8x128xf32>
    %41 = math.exp %40 : vector<8x128xf32>
    %cst_17 = arith.constant dense<0.000000e+00> : vector<8xf32>
    %42 = vector.multi_reduction <add>, %41, %cst_17 [1] : vector<8x128xf32> to vector<8xf32>
    %43 = vector.shape_cast %42 : vector<8xf32> to vector<8x1xf32>
    %44 = vector.broadcast %43 : vector<8x1xf32> to vector<8x128xf32>
    %45 = arith.divf %41, %44 : vector<8x128xf32>
    %c0_18 = arith.constant 0 : index
    %c0_19 = arith.constant 0 : index
    %46 = vector.load %arg2[%c0_18, %c0_19] : memref<8x128xf32, #tpu.memory_space<vmem>>, vector<8x128xf32>
    %cst_20 = arith.constant dense<0xFF800000> : vector<8xf32>
    %47 = vector.multi_reduction <maximumf>, %46, %cst_20 [1] : vector<8x128xf32> to vector<8xf32>
    %48 = vector.shape_cast %47 : vector<8xf32> to vector<8x1xf32>
    %49 = vector.broadcast %48 : vector<8x1xf32> to vector<8x128xf32>
    %50 = arith.subf %46, %49 : vector<8x128xf32>
    %51 = math.exp %50 : vector<8x128xf32>
    %cst_21 = arith.constant dense<0.000000e+00> : vector<8xf32>
    %52 = vector.multi_reduction <add>, %51, %cst_21 [1] : vector<8x128xf32> to vector<8xf32>
    %53 = vector.shape_cast %52 : vector<8xf32> to vector<8x1xf32>
    %54 = vector.broadcast %53 : vector<8x1xf32> to vector<8x128xf32>
    %55 = arith.divf %51, %54 : vector<8x128xf32>
    %56 = tpu.iota {dimensions = array<i32: 1>} : vector<8x128xi32>
    %c0_22 = arith.constant 0 : index
    %c0_23 = arith.constant 0 : index
    %57 = vector.load %arg3[%c0_22, %c0_23] : memref<8x16xi32, #tpu.memory_space<vmem>>, vector<8x16xi32>
    %cst_24 = arith.constant 0.000000e+00 : f32
    %58 = vector.broadcast %cst_24 : f32 to vector<8x128xf32>
    %cst_25 = arith.constant 0.000000e+00 : f32
    %59 = vector.broadcast %cst_25 : f32 to vector<8x128xf32>
    %cst_26 = arith.constant 0.000000e+00 : f32
    %60 = vector.broadcast %cst_26 : f32 to vector<8x128xf32>
    %cst_27 = arith.constant 0.000000e+00 : f32
    %61 = vector.broadcast %cst_27 : f32 to vector<8x128xf32>
    %62 = vector.extract_strided_slice %57 {offsets = [0, 0], sizes = [8, 1], strides = [1, 1]} : vector<8x16xi32> to vector<8x1xi32>
    %63 = vector.broadcast %62 : vector<8x1xi32> to vector<8x128xi32>
    %64 = arith.cmpi eq, %56, %63 : vector<8x128xi32>
    %65 = vector.extract_strided_slice %55 {offsets = [0, 0], sizes = [8, 1], strides = [1, 1]} : vector<8x128xf32> to vector<8x1xf32>
    %cst_28 = arith.constant 0.000000e+00 : f32
    %66 = vector.shape_cast %65 : vector<8x1xf32> to vector<8x1xf32>
    %67 = vector.broadcast %66 : vector<8x1xf32> to vector<8x128xf32>
    %68 = vector.broadcast %cst_28 : f32 to vector<8x128xf32>
    %69 = arith.select %64, %67, %68 : vector<8x128xi1>, vector<8x128xf32>
    %70 = arith.addf %58, %69 : vector<8x128xf32>
    %71 = vector.extract_strided_slice %57 {offsets = [0, 1], sizes = [8, 1], strides = [1, 1]} : vector<8x16xi32> to vector<8x1xi32>
    %72 = vector.broadcast %71 : vector<8x1xi32> to vector<8x128xi32>
    %73 = arith.cmpi eq, %56, %72 : vector<8x128xi32>
    %74 = vector.extract_strided_slice %55 {offsets = [0, 1], sizes = [8, 1], strides = [1, 1]} : vector<8x128xf32> to vector<8x1xf32>
    %cst_29 = arith.constant 0.000000e+00 : f32
    %75 = vector.shape_cast %74 : vector<8x1xf32> to vector<8x1xf32>
    %76 = vector.broadcast %75 : vector<8x1xf32> to vector<8x128xf32>
    %77 = vector.broadcast %cst_29 : f32 to vector<8x128xf32>
    %78 = arith.select %73, %76, %77 : vector<8x128xi1>, vector<8x128xf32>
    %79 = arith.addf %59, %78 : vector<8x128xf32>
    %80 = vector.extract_strided_slice %57 {offsets = [0, 2], sizes = [8, 1], strides = [1, 1]} : vector<8x16xi32> to vector<8x1xi32>
    %81 = vector.broadcast %80 : vector<8x1xi32> to vector<8x128xi32>
    %82 = arith.cmpi eq, %56, %81 : vector<8x128xi32>
    %83 = vector.extract_strided_slice %55 {offsets = [0, 2], sizes = [8, 1], strides = [1, 1]} : vector<8x128xf32> to vector<8x1xf32>
    %cst_30 = arith.constant 0.000000e+00 : f32
    %84 = vector.shape_cast %83 : vector<8x1xf32> to vector<8x1xf32>
    %85 = vector.broadcast %84 : vector<8x1xf32> to vector<8x128xf32>
    %86 = vector.broadcast %cst_30 : f32 to vector<8x128xf32>
    %87 = arith.select %82, %85, %86 : vector<8x128xi1>, vector<8x128xf32>
    %88 = arith.addf %60, %87 : vector<8x128xf32>
    %89 = vector.extract_strided_slice %57 {offsets = [0, 3], sizes = [8, 1], strides = [1, 1]} : vector<8x16xi32> to vector<8x1xi32>
    %90 = vector.broadcast %89 : vector<8x1xi32> to vector<8x128xi32>
    %91 = arith.cmpi eq, %56, %90 : vector<8x128xi32>
    %92 = vector.extract_strided_slice %55 {offsets = [0, 3], sizes = [8, 1], strides = [1, 1]} : vector<8x128xf32> to vector<8x1xf32>
    %cst_31 = arith.constant 0.000000e+00 : f32
    %93 = vector.shape_cast %92 : vector<8x1xf32> to vector<8x1xf32>
    %94 = vector.broadcast %93 : vector<8x1xf32> to vector<8x128xf32>
    %95 = vector.broadcast %cst_31 : f32 to vector<8x128xf32>
    %96 = arith.select %91, %94, %95 : vector<8x128xi1>, vector<8x128xf32>
    %97 = arith.addf %61, %96 : vector<8x128xf32>
    %98 = vector.extract_strided_slice %57 {offsets = [0, 4], sizes = [8, 1], strides = [1, 1]} : vector<8x16xi32> to vector<8x1xi32>
    %99 = vector.broadcast %98 : vector<8x1xi32> to vector<8x128xi32>
    %100 = arith.cmpi eq, %56, %99 : vector<8x128xi32>
    %101 = vector.extract_strided_slice %55 {offsets = [0, 4], sizes = [8, 1], strides = [1, 1]} : vector<8x128xf32> to vector<8x1xf32>
    %cst_32 = arith.constant 0.000000e+00 : f32
    %102 = vector.shape_cast %101 : vector<8x1xf32> to vector<8x1xf32>
    %103 = vector.broadcast %102 : vector<8x1xf32> to vector<8x128xf32>
    %104 = vector.broadcast %cst_32 : f32 to vector<8x128xf32>
    %105 = arith.select %100, %103, %104 : vector<8x128xi1>, vector<8x128xf32>
    %106 = arith.addf %70, %105 : vector<8x128xf32>
    %107 = vector.extract_strided_slice %57 {offsets = [0, 5], sizes = [8, 1], strides = [1, 1]} : vector<8x16xi32> to vector<8x1xi32>
    %108 = vector.broadcast %107 : vector<8x1xi32> to vector<8x128xi32>
    %109 = arith.cmpi eq, %56, %108 : vector<8x128xi32>
    %110 = vector.extract_strided_slice %55 {offsets = [0, 5], sizes = [8, 1], strides = [1, 1]} : vector<8x128xf32> to vector<8x1xf32>
    %cst_33 = arith.constant 0.000000e+00 : f32
    %111 = vector.shape_cast %110 : vector<8x1xf32> to vector<8x1xf32>
    %112 = vector.broadcast %111 : vector<8x1xf32> to vector<8x128xf32>
    %113 = vector.broadcast %cst_33 : f32 to vector<8x128xf32>
    %114 = arith.select %109, %112, %113 : vector<8x128xi1>, vector<8x128xf32>
    %115 = arith.addf %79, %114 : vector<8x128xf32>
    %116 = vector.extract_strided_slice %57 {offsets = [0, 6], sizes = [8, 1], strides = [1, 1]} : vector<8x16xi32> to vector<8x1xi32>
    %117 = vector.broadcast %116 : vector<8x1xi32> to vector<8x128xi32>
    %118 = arith.cmpi eq, %56, %117 : vector<8x128xi32>
    %119 = vector.extract_strided_slice %55 {offsets = [0, 6], sizes = [8, 1], strides = [1, 1]} : vector<8x128xf32> to vector<8x1xf32>
    %cst_34 = arith.constant 0.000000e+00 : f32
    %120 = vector.shape_cast %119 : vector<8x1xf32> to vector<8x1xf32>
    %121 = vector.broadcast %120 : vector<8x1xf32> to vector<8x128xf32>
    %122 = vector.broadcast %cst_34 : f32 to vector<8x128xf32>
    %123 = arith.select %118, %121, %122 : vector<8x128xi1>, vector<8x128xf32>
    %124 = arith.addf %88, %123 : vector<8x128xf32>
    %125 = vector.extract_strided_slice %57 {offsets = [0, 7], sizes = [8, 1], strides = [1, 1]} : vector<8x16xi32> to vector<8x1xi32>
    %126 = vector.broadcast %125 : vector<8x1xi32> to vector<8x128xi32>
    %127 = arith.cmpi eq, %56, %126 : vector<8x128xi32>
    %128 = vector.extract_strided_slice %55 {offsets = [0, 7], sizes = [8, 1], strides = [1, 1]} : vector<8x128xf32> to vector<8x1xf32>
    %cst_35 = arith.constant 0.000000e+00 : f32
    %129 = vector.shape_cast %128 : vector<8x1xf32> to vector<8x1xf32>
    %130 = vector.broadcast %129 : vector<8x1xf32> to vector<8x128xf32>
    %131 = vector.broadcast %cst_35 : f32 to vector<8x128xf32>
    %132 = arith.select %127, %130, %131 : vector<8x128xi1>, vector<8x128xf32>
    %133 = arith.addf %97, %132 : vector<8x128xf32>
    %134 = vector.extract_strided_slice %57 {offsets = [0, 8], sizes = [8, 1], strides = [1, 1]} : vector<8x16xi32> to vector<8x1xi32>
    %135 = vector.broadcast %134 : vector<8x1xi32> to vector<8x128xi32>
    %136 = arith.cmpi eq, %56, %135 : vector<8x128xi32>
    %137 = vector.extract_strided_slice %55 {offsets = [0, 8], sizes = [8, 1], strides = [1, 1]} : vector<8x128xf32> to vector<8x1xf32>
    %cst_36 = arith.constant 0.000000e+00 : f32
    %138 = vector.shape_cast %137 : vector<8x1xf32> to vector<8x1xf32>
    %139 = vector.broadcast %138 : vector<8x1xf32> to vector<8x128xf32>
    %140 = vector.broadcast %cst_36 : f32 to vector<8x128xf32>
    %141 = arith.select %136, %139, %140 : vector<8x128xi1>, vector<8x128xf32>
    %142 = arith.addf %106, %141 : vector<8x128xf32>
    %143 = vector.extract_strided_slice %57 {offsets = [0, 9], sizes = [8, 1], strides = [1, 1]} : vector<8x16xi32> to vector<8x1xi32>
    %144 = vector.broadcast %143 : vector<8x1xi32> to vector<8x128xi32>
    %145 = arith.cmpi eq, %56, %144 : vector<8x128xi32>
    %146 = vector.extract_strided_slice %55 {offsets = [0, 9], sizes = [8, 1], strides = [1, 1]} : vector<8x128xf32> to vector<8x1xf32>
    %cst_37 = arith.constant 0.000000e+00 : f32
    %147 = vector.shape_cast %146 : vector<8x1xf32> to vector<8x1xf32>
    %148 = vector.broadcast %147 : vector<8x1xf32> to vector<8x128xf32>
    %149 = vector.broadcast %cst_37 : f32 to vector<8x128xf32>
    %150 = arith.select %145, %148, %149 : vector<8x128xi1>, vector<8x128xf32>
    %151 = arith.addf %115, %150 : vector<8x128xf32>
    %152 = vector.extract_strided_slice %57 {offsets = [0, 10], sizes = [8, 1], strides = [1, 1]} : vector<8x16xi32> to vector<8x1xi32>
    %153 = vector.broadcast %152 : vector<8x1xi32> to vector<8x128xi32>
    %154 = arith.cmpi eq, %56, %153 : vector<8x128xi32>
    %155 = vector.extract_strided_slice %55 {offsets = [0, 10], sizes = [8, 1], strides = [1, 1]} : vector<8x128xf32> to vector<8x1xf32>
    %cst_38 = arith.constant 0.000000e+00 : f32
    %156 = vector.shape_cast %155 : vector<8x1xf32> to vector<8x1xf32>
    %157 = vector.broadcast %156 : vector<8x1xf32> to vector<8x128xf32>
    %158 = vector.broadcast %cst_38 : f32 to vector<8x128xf32>
    %159 = arith.select %154, %157, %158 : vector<8x128xi1>, vector<8x128xf32>
    %160 = arith.addf %124, %159 : vector<8x128xf32>
    %161 = vector.extract_strided_slice %57 {offsets = [0, 11], sizes = [8, 1], strides = [1, 1]} : vector<8x16xi32> to vector<8x1xi32>
    %162 = vector.broadcast %161 : vector<8x1xi32> to vector<8x128xi32>
    %163 = arith.cmpi eq, %56, %162 : vector<8x128xi32>
    %164 = vector.extract_strided_slice %55 {offsets = [0, 11], sizes = [8, 1], strides = [1, 1]} : vector<8x128xf32> to vector<8x1xf32>
    %cst_39 = arith.constant 0.000000e+00 : f32
    %165 = vector.shape_cast %164 : vector<8x1xf32> to vector<8x1xf32>
    %166 = vector.broadcast %165 : vector<8x1xf32> to vector<8x128xf32>
    %167 = vector.broadcast %cst_39 : f32 to vector<8x128xf32>
    %168 = arith.select %163, %166, %167 : vector<8x128xi1>, vector<8x128xf32>
    %169 = arith.addf %133, %168 : vector<8x128xf32>
    %170 = vector.extract_strided_slice %57 {offsets = [0, 12], sizes = [8, 1], strides = [1, 1]} : vector<8x16xi32> to vector<8x1xi32>
    %171 = vector.broadcast %170 : vector<8x1xi32> to vector<8x128xi32>
    %172 = arith.cmpi eq, %56, %171 : vector<8x128xi32>
    %173 = vector.extract_strided_slice %55 {offsets = [0, 12], sizes = [8, 1], strides = [1, 1]} : vector<8x128xf32> to vector<8x1xf32>
    %cst_40 = arith.constant 0.000000e+00 : f32
    %174 = vector.shape_cast %173 : vector<8x1xf32> to vector<8x1xf32>
    %175 = vector.broadcast %174 : vector<8x1xf32> to vector<8x128xf32>
    %176 = vector.broadcast %cst_40 : f32 to vector<8x128xf32>
    %177 = arith.select %172, %175, %176 : vector<8x128xi1>, vector<8x128xf32>
    %178 = arith.addf %142, %177 : vector<8x128xf32>
    %179 = vector.extract_strided_slice %57 {offsets = [0, 13], sizes = [8, 1], strides = [1, 1]} : vector<8x16xi32> to vector<8x1xi32>
    %180 = vector.broadcast %179 : vector<8x1xi32> to vector<8x128xi32>
    %181 = arith.cmpi eq, %56, %180 : vector<8x128xi32>
    %182 = vector.extract_strided_slice %55 {offsets = [0, 13], sizes = [8, 1], strides = [1, 1]} : vector<8x128xf32> to vector<8x1xf32>
    %cst_41 = arith.constant 0.000000e+00 : f32
    %183 = vector.shape_cast %182 : vector<8x1xf32> to vector<8x1xf32>
    %184 = vector.broadcast %183 : vector<8x1xf32> to vector<8x128xf32>
    %185 = vector.broadcast %cst_41 : f32 to vector<8x128xf32>
    %186 = arith.select %181, %184, %185 : vector<8x128xi1>, vector<8x128xf32>
    %187 = arith.addf %151, %186 : vector<8x128xf32>
    %188 = vector.extract_strided_slice %57 {offsets = [0, 14], sizes = [8, 1], strides = [1, 1]} : vector<8x16xi32> to vector<8x1xi32>
    %189 = vector.broadcast %188 : vector<8x1xi32> to vector<8x128xi32>
    %190 = arith.cmpi eq, %56, %189 : vector<8x128xi32>
    %191 = vector.extract_strided_slice %55 {offsets = [0, 14], sizes = [8, 1], strides = [1, 1]} : vector<8x128xf32> to vector<8x1xf32>
    %cst_42 = arith.constant 0.000000e+00 : f32
    %192 = vector.shape_cast %191 : vector<8x1xf32> to vector<8x1xf32>
    %193 = vector.broadcast %192 : vector<8x1xf32> to vector<8x128xf32>
    %194 = vector.broadcast %cst_42 : f32 to vector<8x128xf32>
    %195 = arith.select %190, %193, %194 : vector<8x128xi1>, vector<8x128xf32>
    %196 = arith.addf %160, %195 : vector<8x128xf32>
    %197 = vector.extract_strided_slice %57 {offsets = [0, 15], sizes = [8, 1], strides = [1, 1]} : vector<8x16xi32> to vector<8x1xi32>
    %198 = vector.broadcast %197 : vector<8x1xi32> to vector<8x128xi32>
    %199 = arith.cmpi eq, %56, %198 : vector<8x128xi32>
    %200 = vector.extract_strided_slice %55 {offsets = [0, 15], sizes = [8, 1], strides = [1, 1]} : vector<8x128xf32> to vector<8x1xf32>
    %cst_43 = arith.constant 0.000000e+00 : f32
    %201 = vector.shape_cast %200 : vector<8x1xf32> to vector<8x1xf32>
    %202 = vector.broadcast %201 : vector<8x1xf32> to vector<8x128xf32>
    %203 = vector.broadcast %cst_43 : f32 to vector<8x128xf32>
    %204 = arith.select %199, %202, %203 : vector<8x128xi1>, vector<8x128xf32>
    %205 = arith.addf %169, %204 : vector<8x128xf32>
    %206 = arith.addf %178, %187 : vector<8x128xf32>
    %207 = arith.addf %196, %205 : vector<8x128xf32>
    %208 = arith.addf %206, %207 : vector<8x128xf32>
    %209 = vector.extract_strided_slice %45 {offsets = [0, 0], sizes = [8, 1], strides = [1, 1]} : vector<8x128xf32> to vector<8x1xf32>
    %210 = vector.broadcast %209 : vector<8x1xf32> to vector<8x128xf32>
    %211 = arith.mulf %210, %21 : vector<8x128xf32>
    %212 = vector.extract_strided_slice %45 {offsets = [0, 1], sizes = [8, 1], strides = [1, 1]} : vector<8x128xf32> to vector<8x1xf32>
    %213 = vector.broadcast %212 : vector<8x1xf32> to vector<8x128xf32>
    %214 = arith.mulf %213, %208 : vector<8x128xf32>
    %215 = arith.addf %211, %214 : vector<8x128xf32>
    %c0_44 = arith.constant 0 : index
    %c0_45 = arith.constant 0 : index
    %216 = vector.load %arg8[%c0_44, %c0_45] : memref<8x128xf32, #tpu.memory_space<vmem>>, vector<8x128xf32>
    tpu.vector_store %arg8[%c0_44, %c0_45], %215 {strides = array<i32>} : memref<8x128xf32, #tpu.memory_space<vmem>>, vector<8x128xf32>,
    %c0_46 = arith.constant 0 : index
    %c0_47 = arith.constant 0 : index
    %217 = vector.load %arg9[%c0_46, %c0_47] : memref<8x128xf32, #tpu.memory_space<vmem>>, vector<8x128xf32>
    tpu.vector_store %arg9[%c0_46, %c0_47], %21 {strides = array<i32>} : memref<8x128xf32, #tpu.memory_space<vmem>>, vector<8x128xf32>,
    %218 = tpu.concatenate %45, %55 in 1 : vector<8x128xf32>, vector<8x128xf32> -> vector<8x256xf32>
    %c0_48 = arith.constant 0 : index
    %c0_49 = arith.constant 0 : index
    %219 = vector.load %arg10[%c0_48, %c0_49] : memref<8x256xf32, #tpu.memory_space<vmem>>, vector<8x256xf32>
    tpu.vector_store %arg10[%c0_48, %c0_49], %218 {strides = array<i32>} : memref<8x256xf32, #tpu.memory_space<vmem>>, vector<8x256xf32>,
    return
  }
  func.func @transform_0(%arg0: i32) -> (i32, i32) {
    %c0_i32 = arith.constant 0 : i32
    %c0_i32_0 = arith.constant 0 : i32
    return %arg0, %c0_i32 : i32, i32
  }
  func.func @transform_1(%arg0: i32) -> (i32, i32) {
    %c0_i32 = arith.constant 0 : i32
    %c0_i32_0 = arith.constant 0 : i32
    return %arg0, %c0_i32 : i32, i32
  }
  func.func @transform_2(%arg0: i32) -> (i32, i32) {
    %c0_i32 = arith.constant 0 : i32
    %c0_i32_0 = arith.constant 0 : i32
    return %arg0, %c0_i32 : i32, i32
  }
  func.func @transform_3(%arg0: i32) -> (i32, i32) {
    %c0_i32 = arith.constant 0 : i32
    %c0_i32_0 = arith.constant 0 : i32
    return %arg0, %c0_i32 : i32, i32
  }
  func.func @transform_4(%arg0: i32) -> (i32, i32) {
    %c0_i32 = arith.constant 0 : i32
    %c0_i32_0 = arith.constant 0 : i32
    %c0_i32_1 = arith.constant 0 : i32
    return %c0_i32, %c0_i32_0 : i32, i32
  }
  func.func @transform_5(%arg0: i32) -> (i32, i32) {
    %c0_i32 = arith.constant 0 : i32
    %c0_i32_0 = arith.constant 0 : i32
    %c0_i32_1 = arith.constant 0 : i32
    return %c0_i32, %c0_i32_0 : i32, i32
  }
  func.func @transform_6(%arg0: i32) -> (i32, i32) {
    %c0_i32 = arith.constant 0 : i32
    %c0_i32_0 = arith.constant 0 : i32
    %c0_i32_1 = arith.constant 0 : i32
    return %c0_i32, %c0_i32_0 : i32, i32
  }
  func.func @transform_7(%arg0: i32) -> (i32, i32) {
    %c0_i32 = arith.constant 0 : i32
    %c0_i32_0 = arith.constant 0 : i32
    return %arg0, %c0_i32 : i32, i32
  }
  func.func @transform_8(%arg0: i32) -> (i32, i32) {
    %c0_i32 = arith.constant 0 : i32
    %c0_i32_0 = arith.constant 0 : i32
    return %arg0, %c0_i32 : i32, i32
  }
  func.func @transform_9(%arg0: i32) -> (i32, i32) {
    %c0_i32 = arith.constant 0 : i32
    %c0_i32_0 = arith.constant 0 : i32
    return %arg0, %c0_i32 : i32, i32
  }
}

</mosaic_0001>

<bundles_post_ra>
// kernel: ptrgen_forward.1
= control target key start
LH: loop header
LB: loop body
LE: loop exit
PB: predicated region body
PF: predicated region fallthrough
CT: control target
= control target key end

     0   :  { %15 = vsyncpa [#allocation3], 0  ;;  %s761_s0 = inlined_call_operand.vmem [shape: bf16[8,32], index: 0, kind: input, shape index: {}]   ;;  %s762_s1 = inlined_call_operand.vmem [shape: f32[8,128], index: 1, kind: input, shape index: {}]   ;;  %s763_s2 = inlined_call_operand.vmem [shape: s32[8,16], index: 2, kind: input, shape index: {}]   ;;  %s764_s3 = inlined_call_operand.vmem [shape: f32[8,128], index: 3, kind: input, shape index: {}]   ;;  %s765_s4 = inlined_call_operand.vmem [shape: f32[1,128], index: 4, kind: input, shape index: {}]   ;;  %s766_s5 = inlined_call_operand.hbm [shape: bf16[32,256], index: 5, kind: input, shape index: {}]   ;;  %s767_s6 = inlined_call_operand.vmem [shape: f32[1,256], index: 6, kind: input, shape index: {}]   ;;  %s768_s7 = inlined_call_operand.hbm [shape: f32[8,128], index: 7, kind: output, shape index: {0}]   ;;  %s769_s8 = inlined_call_operand.hbm [shape: f32[8,128], index: 8, kind: output, shape index: {1}]   ;;  %s770_s9 = inlined_call_operand.vmem [shape: f32[8,256], index: 9, kind: output, shape index: {2}]  }
   0x1   :  { %16 = vsyncpa [#allocation4], 0 }
   0x2   :  { %17 = vsyncpa [#allocation7], 0  ;;  %s541_s30 = smov [#allocation2]   ;;  %s469_s13 = scalar_lea.hbm %s766_s5, 512 }
   0x3   :  { %s33_s10 = sshll.u32 %s541_s30, 4  ;;  %p470_p0 = scmp.ne.s32.totalorder %s766_s5, %s469_s13  ;;  %s34_s10 = int_to_ptr.vmem [resolvable:$true] %s33_s10 }
   0x4   :  { %p473_p1 = scmp.lt.u32.totalorder %s469_s13, %s766_s5 }
   0x6   :  { %p475_p2 = pnand %p473_p1, %p470_p0 }
   0x8   :  { %478 = shalt.err (!%p475_p2)
}
   0x9   :  { %s479_s18 = scalar_lea.vmem %s34_s10, 512  ;;  %p484_p4 = scmp.lt.s32.totalorder %s34_s10, %s34_s10 }
   0xa   :  { %p480_p3 = scmp.ne.s32.totalorder %s34_s10, %s479_s18  ;;  %p485_p5 = scmp.lt.s32.totalorder %s479_s18, %s479_s18 }
   0xc   :  { %p486_p6 = por %p485_p5, %p484_p4 }
   0xe   :  { %p487_p7 = pnand %p486_p6, %p480_p3 }
  0x10   :  { %490 = shalt.err (!%p487_p7)
}
  0x11   :  { %s542_s19 = smov 128   ;;  %s543_s20 = smov 8  }
  0x12   :  { %39 = dma.hbm_to_vmem [thread:$0]  %s766_s5, 512, %s34_s10, [#allocation3], %s542_s19, %s542_s19, %s543_s20  }
  0x13   :  { %535 = dma.done.wait [#allocation3], 512  }
  0x14   :  { %536 = vsyncadd [#allocation3], 4294966784  ;;  %v544_v0 = vmov 0   ;;  %v451_v1 = vld [vmem:[#allocation2 + $0x4] ss:$8 sps:$4 sm:$0xff]   ;;  %vm84_vm0 = vcmask 261120   ;;  %v54_v19 = vlaneseq }
  0x15   :  { %120 = vmatprep.mubr.bf16.mxu0 %v544_v0  ;;  %417 = vset.pattern.permute.xlu1 %v544_v0  ;;  %v46_v2 = vld [vmem:[%s764_s3] sm:$0xff]  ;;  %v454_v6 = vld [vmem:[#allocation2 + $0x14] ss:$8 sps:$4 sm:$0xff]   ;;  %v456_v7 = vld [vmem:[#allocation2 + $0x10] ss:$8 sps:$4 sm:$0xff]   ;;  %v545_v11 = vmov 1  }
  0x16   :  { %v395_v3 = vld [vmem:[%s765_s4] ss:$0 sm:$0xff]  ;;  %88 = vmatprep.subr.bf16.mxu0 %v451_v1  ;;  %v546_v12 = vmov 2   ;;  %v547_v18 = vmov 5   ;;  %v55_v20 = vshrl.u32 %v54_v19, 7  ;;  %v652_v28 = vand.u32 127, %v54_v19 }
  0x17   :  { %v453_v4 = vld [vmem:[#allocation2] ss:$8 sps:$4 sm:$0xff]   ;;  %v147_v5 = vmul.f32 %v395_v3, %v46_v2  ;;  %422 = vset.pattern.permute.xlu0 %v547_v18  ;;  %vm129_vm2 = vcmp.gt.f32.partialorder %v46_v2, 0.0  ;;  %v548_v37 = vmov 3   ;;  %v549_v38 = vmov 4   ;;  %s560_s11 = smov [#allocation6]  }
  0x18   :  { %89 = vmatpush1.bf16.msra.mxu0 %v453_v4  ;;  %v166_v8 = vld [vmem:[%s762_s1] sm:$0xff]  ;;  %v56_v21 = vsub.s32 0, %v55_v20  ;;  %v60_v23 = vsub.s32 1, %v55_v20  ;;  %v550_v39 = vmov 6   ;;  %v551_v43 = vmov 7   ;;  %s373_s12 = sshll.u32 %s560_s11, 4  ;;  %s374_s12 = int_to_ptr.vmem [resolvable:$true] %s373_s12 }
  0x19   :  { %148 = vadd.xlane.f32.xlu0 %v147_v5  ;;  %90 = vmatprep.subr.bf16.mxu0 %v454_v6  ;;  %v47_v9 = vld [vmem:[%s761_s0] sm:$0xf]  ;;  %v552_v54 = vmov 9   ;;  %v553_v55 = vmov 10   ;;  %v554_v56 = vmov 8   ;;  %v555_v57 = vmov 11   ;;  %p496_p9 = scmp.lt.s32.totalorder %s374_s12, %s374_s12 }
  0x1a   :  { %v641_v10 = vld [vmem:[%s763_s2] sm:$0xff]  ;;  %v556_v59 = vmov 13   ;;  %v557_v61 = vmov 12   ;;  %v558_v63 = vmov 14   ;;  %v559_v1 = vmov 15   ;;  %s491_s13 = scalar_lea.vmem %s374_s12, 128 }
  0x1b   :  { %178 = vperm.xlu1 %417, %v641_v10   ;;  %v52_v22 = vld [vmem:[%s767_s6] sm:$0x3]  ;;  %p492_p8 = scmp.ne.s32.totalorder %s374_s12, %s491_s13  ;;  %p497_p10 = scmp.lt.s32.totalorder %s491_s13, %s491_s13 }
  0x1c   :  { %91 = vmatpush1.bf16.msra.mxu0 %v456_v7  ;;  %v57_v25 = vrot.slane %v52_v22, %v56_v21  ;;  %v61_v26 = vrot.slane %v52_v22, %v60_v23 }
  0x1d   :  { %167 = vmax.xlane.f32.xlu0 %v166_v8  ;;  %p498_p11 = por %p497_p10, %p496_p9 }
  0x1f   :  { %394 = vmatmul.mubr.msk.bf16.vlgmr.msra.gmra.mrb[0].mxu0 %vm84_vm0, %v47_v9  ;;  %418 = vset.pattern.permute.xlu1 %v545_v11  ;;  %p499_p12 = pnand %p498_p11, %p492_p8 }
  0x20   :  { %189 = vperm.xlu1 %418, %v641_v10  }
  0x24   :  { %419 = vset.pattern.permute.xlu1 %v546_v12 }
  0x9a   :  { %v672_v44 = vpop.permute.xlu1 %178 }
  0x9b   :  { %vm180_vm7 = vcmp.eq.s32.totalorder %v652_v28, %v672_v44 }
  0x9f   :  { %v674_v45 = vpop.permute.xlu1 %189 }
  0xa0   :  { %vm191_vm9 = vcmp.eq.s32.totalorder %v652_v28, %v674_v45 }
  0xa6   :  { %v149_v13 = vpop.xlane.xlu0 %148 }
  0xa7   :  { %vm150_vm1 = vcmp.gt.f32.partialorder %v149_v13, 0.0 }
  0xa8   :  { %v151_v24 = vsel %vm150_vm1, 1, %v544_v0 }
  0xa9   :  { %v152_v27 = vadd.s32 1, %v151_v24 }
  0xaa   :  { %v168_v14 = vpop.xlane.xlu0 %167 }
  0xab   :  { %v169_v15 = vsub.f32 %v166_v8, %v168_v14  ;;  %vm155_vm3 = vcmp.lt.s32.totalorder %v652_v28, %v152_v27 }
  0xad   :  { %v170_v16 = vmul.f32 1.442695, %v169_v15 }
  0xaf   :  { %457 = vpow2.f32 %v170_v16 }
  0xb9   :  { %v458_v17 = vpop.eup %457 }
  0xba   :  { %172 = vadd.xlane.f32.xlu0 %v458_v17 }
  0xd0   :  { %229 = vperm.xlu0 %422, %v641_v10  }
  0xd4   :  { %424 = vset.pattern.permute.xlu0 %v544_v0 }
  0xf2   :  { %v122_v29 = vpop.f32.mrb[0].mxu0 }
  0xf3   :  { %v123_v30 = vadd.f32 %v122_v29, %v57_v25  ;;  %v124_v31 = vpop.f32.mrb[1].mxu0 }
  0xf4   :  { %v125_v32 = vadd.f32 %v124_v31, %v61_v26  ;;  %v126_v33 = vpop.f32.mrb[2].mxu0 }
  0xf5   :  { %v127_v34 = vpop.f32.mrb[3].mxu0  ;;  %v130_v35 = vsel %vm129_vm2, %v123_v30, -inf }
  0xf6   :  { %131 = vmax.xlane.f32.xlu1 %v130_v35  ;;  %v156_v36 = vsel %vm155_vm3, %v125_v32, -inf }
  0xfa   :  { %157 = vmax.xlane.f32.xlu1 %v156_v36 }
 0x10b   :  { %199 = vperm.xlu1 %419, %v641_v10  }
 0x10f   :  { %420 = vset.pattern.permute.xlu1 %v548_v37 }
 0x110   :  { %209 = vperm.xlu1 %420, %v641_v10  }
 0x114   :  { %421 = vset.pattern.permute.xlu1 %v549_v38 }
 0x115   :  { %219 = vperm.xlu1 %421, %v641_v10  }
 0x119   :  { %423 = vset.pattern.permute.xlu1 %v550_v39 }
 0x11a   :  { %239 = vperm.xlu1 %423, %v641_v10  }
 0x11e   :  { %425 = vset.pattern.permute.xlu1 %v545_v11 }
 0x147   :  { %v173_v40 = vpop.xlane.xlu0 %172 }
 0x148   :  { %459 = vrcp.f32 %v173_v40 }
 0x14f   :  { %v230_v6 = vpop.permute.xlu0 %229 }
 0x150   :  { %vm231_vm8 = vcmp.eq.s32.totalorder %v652_v28, %v230_v6 }
 0x152   :  { %v460_v41 = vpop.eup %459 }
 0x153   :  { %v660_v42 = vmul.f32 %v460_v41, %v458_v17 }
 0x155   :  { %356 = vst [vmem:[%s770_s9 + $0x8] sm:$0xff] %v660_v42  ;;  %183 = vperm.xlu0 %424, %v660_v42   ;;  %193 = vperm.xlu1 %425, %v660_v42  }
 0x159   :  { %426 = vset.pattern.permute.xlu1 %v546_v12  ;;  %430 = vset.pattern.permute.xlu0 %v550_v39 }
 0x15a   :  { %203 = vperm.xlu1 %426, %v660_v42  }
 0x15e   :  { %427 = vset.pattern.permute.xlu1 %v548_v37 }
 0x15f   :  { %213 = vperm.xlu1 %427, %v660_v42  }
 0x163   :  { %428 = vset.pattern.permute.xlu1 %v549_v38 }
 0x164   :  { %223 = vperm.xlu1 %428, %v660_v42  }
 0x168   :  { %429 = vset.pattern.permute.xlu1 %v547_v18 }
 0x169   :  { %233 = vperm.xlu1 %429, %v660_v42  }
 0x16d   :  { %431 = vset.pattern.permute.xlu1 %v551_v43 }
 0x183   :  { %v132_v46 = vpop.xlane.xlu1 %131 }
 0x184   :  { %v133_v47 = vsub.f32 %v130_v35, %v132_v46 }
 0x186   :  { %v134_v48 = vmul.f32 1.442695, %v133_v47 }
 0x187   :  { %v158_v49 = vpop.xlane.xlu1 %157 }
 0x188   :  { %461 = vpow2.f32 %v134_v48  ;;  %v159_v50 = vsub.f32 %v156_v36, %v158_v49 }
 0x18a   :  { %v160_v51 = vmul.f32 1.442695, %v159_v50 }
 0x18b   :  { %v200_v58 = vpop.permute.xlu1 %199 }
 0x18c   :  { %463 = vpow2.f32 %v160_v51  ;;  %vm201_vm4 = vcmp.eq.s32.totalorder %v652_v28, %v200_v58 }
 0x18f   :  { %v210_v60 = vpop.permute.xlu1 %209 }
 0x190   :  { %vm211_vm5 = vcmp.eq.s32.totalorder %v652_v28, %v210_v60 }
 0x192   :  { %v676_v52 = vpop.eup %461 }
 0x193   :  { %136 = vadd.xlane.f32.xlu1 %v676_v52 }
 0x194   :  { %v220_v62 = vpop.permute.xlu1 %219 }
 0x195   :  { %vm221_vm6 = vcmp.eq.s32.totalorder %v652_v28, %v220_v62 }
 0x196   :  { %v679_v53 = vpop.eup %463 }
 0x197   :  { %162 = vadd.xlane.f32.xlu0 %v679_v53 }
 0x199   :  { %v240_v2 = vpop.permute.xlu1 %239 }
 0x19a   :  { %vm241_vm10 = vcmp.eq.s32.totalorder %v652_v28, %v240_v2 }
 0x1a4   :  { %249 = vperm.xlu1 %431, %v641_v10  }
 0x1a8   :  { %253 = vperm.xlu1 %431, %v660_v42  }
 0x1ac   :  { %433 = vset.pattern.permute.xlu1 %v552_v54 }
 0x1ad   :  { %269 = vperm.xlu1 %433, %v641_v10   ;;  %243 = vperm.xlu0 %430, %v660_v42  }
 0x1b1   :  { %434 = vset.pattern.permute.xlu1 %v553_v55  ;;  %432 = vset.pattern.permute.xlu0 %v554_v56 }
 0x1b2   :  { %279 = vperm.xlu1 %434, %v641_v10   ;;  %259 = vperm.xlu0 %432, %v641_v10  }
 0x1b6   :  { %436 = vset.pattern.permute.xlu1 %v554_v56  ;;  %435 = vset.pattern.permute.xlu0 %v555_v57 }
 0x1b7   :  { %263 = vperm.xlu1 %436, %v660_v42   ;;  %289 = vperm.xlu0 %435, %v641_v10  }
 0x1bb   :  { %437 = vset.pattern.permute.xlu1 %v552_v54  ;;  %438 = vset.pattern.permute.xlu0 %v553_v55 }
 0x1bc   :  { %273 = vperm.xlu1 %437, %v660_v42   ;;  %283 = vperm.xlu0 %438, %v660_v42  }
 0x1c0   :  { %439 = vset.pattern.permute.xlu1 %v555_v57  ;;  %441 = vset.pattern.permute.xlu0 %v556_v59 }
 0x1c1   :  { %293 = vperm.xlu1 %439, %v660_v42   ;;  %309 = vperm.xlu0 %441, %v641_v10  }
 0x1c5   :  { %440 = vset.pattern.permute.xlu1 %v557_v61  ;;  %444 = vset.pattern.permute.xlu0 %v557_v61 }
 0x1c6   :  { %299 = vperm.xlu1 %440, %v641_v10   ;;  %303 = vperm.xlu0 %444, %v660_v42  }
 0x1ca   :  { %442 = vset.pattern.permute.xlu1 %v558_v63  ;;  %447 = vset.pattern.permute.xlu0 %v559_v1 }
 0x1cb   :  { %319 = vperm.xlu1 %442, %v641_v10   ;;  %333 = vperm.xlu0 %447, %v660_v42  }
 0x1cf   :  { %443 = vset.pattern.permute.xlu1 %v559_v1  ;;  %450 = vset.pattern.permute.xlu0 %v545_v11 }
 0x1d0   :  { %329 = vperm.xlu1 %443, %v641_v10  }
 0x1d4   :  { %v194_v3 = vpop.permute.xlu1 %193  ;;  %445 = vset.pattern.permute.xlu1 %v556_v59  ;;  %v184_v9 = vpop.permute.xlu0 %183 }
 0x1d5   :  { %313 = vperm.xlu1 %445, %v660_v42   ;;  %v186_v12 = vsel %vm180_vm7, %v184_v9, 0.0 }
 0x1d9   :  { %v204_v4 = vpop.permute.xlu1 %203  ;;  %446 = vset.pattern.permute.xlu1 %v558_v63 }
 0x1da   :  { %v206_v5 = vsel %vm201_vm4, %v204_v4, 0.0  ;;  %323 = vperm.xlu1 %446, %v660_v42  }
 0x1de   :  { %v214_v7 = vpop.permute.xlu1 %213  ;;  %448 = vset.pattern.permute.xlu1 %v544_v0  ;;  %v196_v0 = vsel %vm191_vm9, %v194_v3, 0.0 }
 0x1df   :  { %v705_v8 = vsel %vm211_vm5, %v214_v7, 0.0 }
 0x1e3   :  { %v224_v10 = vpop.permute.xlu1 %223 }
 0x1e4   :  { %v226_v13 = vsel %vm221_vm6, %v224_v10, 0.0 }
 0x1e5   :  { %v710_v14 = vadd.f32 %v226_v13, %v186_v12 }
 0x1e8   :  { %v234_v15 = vpop.permute.xlu1 %233 }
 0x1e9   :  { %v236_v16 = vsel %vm231_vm8, %v234_v15, 0.0 }
 0x1ea   :  { %v237_v17 = vadd.f32 %v236_v16, %v196_v0 }
 0x220   :  { %v137_v18 = vpop.xlane.xlu1 %136 }
 0x221   :  { %465 = vrcp.f32 %v137_v18 }
 0x224   :  { %v163_v19 = vpop.xlane.xlu0 %162  ;;  %v250_v20 = vpop.permute.xlu1 %249 }
 0x225   :  { %467 = vrcp.f32 %v163_v19 }
 0x228   :  { %v254_v21 = vpop.permute.xlu1 %253 }
 0x22b   :  { %v466_v22 = vpop.eup %465 }
 0x22c   :  { %v244_v23 = vpop.permute.xlu0 %243  ;;  %v270_v24 = vpop.permute.xlu1 %269  ;;  %v717_v25 = vmul.f32 %v466_v22, %v676_v52 }
 0x22d   :  { %v246_v26 = vsel %vm241_vm10, %v244_v23, 0.0 }
 0x22e   :  { %v247_v27 = vadd.f32 %v246_v26, %v206_v5  ;;  %354 = vst [vmem:[#allocation6] sm:$0xff] %v717_v25 }
 0x22f   :  { %v468_v29 = vpop.eup %467 }
 0x230   :  { %v165_v30 = vmul.f32 %v468_v29, %v679_v53 }
 0x231   :  { %v280_v31 = vpop.permute.xlu1 %279  ;;  %v260_v33 = vpop.permute.xlu0 %259 }
 0x232   :  { %343 = vperm.xlu1 %448, %v165_v30   ;;  %355 = vst [vmem:[%s770_s9] sm:$0xff] %v165_v30 }
 0x236   :  { %449 = vset.pattern.permute.xlu1 %v545_v11  ;;  %v264_v32 = vpop.permute.xlu1 %263 }
 0x237   :  { %348 = vperm.xlu1 %449, %v165_v30  }
 0x23b   :  { %v274_v34 = vpop.permute.xlu1 %273 }
 0x23c   :  { %502 = shalt.err (!%p499_p12)
}
 0x23d   :  { %s503_s9 = scalar_lea.hbm %s769_s8, 128 }
 0x23e   :  { %p504_p13 = scmp.ne.s32.totalorder %s769_s8, %s503_s9  ;;  %p507_p0 = scmp.lt.u32.totalorder %s503_s9, %s769_s8 }
 0x240   :  { %p509_p1 = pnand %p507_p0, %p504_p13 }
 0x242   :  { %512 = shalt.err (!%p509_p1)
}
 0x243   :  { %376 = dma.vmem_to_hbm [thread:$0]  %s374_s12, 128, %s769_s8, [#allocation7]   ;;  %v290_v11 = vpop.permute.xlu0 %289  ;;  %v294_v35 = vpop.permute.xlu1 %293  ;;  %vm271_vm11 = vcmp.eq.s32.totalorder %v652_v28, %v270_v24  ;;  %vm261_vm12 = vcmp.eq.s32.totalorder %v652_v28, %v260_v33  ;;  %vm251_vm14 = vcmp.eq.s32.totalorder %v652_v28, %v250_v20  ;;  %vm281_vm0 = vcmp.eq.s32.totalorder %v652_v28, %v280_v31 }
 0x244   :  { %v266_v42 = vsel %vm261_vm12, %v264_v32, 0.0  ;;  %v276_v43 = vsel %vm271_vm11, %v274_v34, 0.0  ;;  %vm291_vm1 = vcmp.eq.s32.totalorder %v652_v28, %v290_v11  ;;  %v256_v45 = vsel %vm251_vm14, %v254_v21, 0.0  ;;  %s561_s8 = smov [#allocation5]  }
 0x245   :  { %v267_v46 = vadd.f32 %v266_v42, %v710_v14  ;;  %v277_v47 = vadd.f32 %v276_v43, %v237_v17  ;;  %v296_v51 = vsel %vm291_vm1, %v294_v35, 0.0  ;;  %v257_v54 = vadd.f32 %v256_v45, %v705_v8  ;;  %s363_s22 = sshll.u32 %s561_s8, 4  ;;  %s364_s22 = int_to_ptr.vmem [resolvable:$true] %s363_s22 }
 0x246   :  { %s513_s23 = scalar_lea.vmem %s364_s22, 128  ;;  %p518_p3 = scmp.lt.s32.totalorder %s364_s22, %s364_s22 }
 0x247   :  { %v284_v36 = vpop.permute.xlu0 %283  ;;  %v300_v37 = vpop.permute.xlu1 %299  ;;  %v297_v59 = vadd.f32 %v296_v51, %v257_v54  ;;  %p514_p2 = scmp.ne.s32.totalorder %s364_s22, %s513_s23  ;;  %p519_p4 = scmp.lt.s32.totalorder %s513_s23, %s513_s23 }
 0x248   :  { %vm301_vm13 = vcmp.eq.s32.totalorder %v652_v28, %v300_v37  ;;  %v286_v50 = vsel %vm281_vm0, %v284_v36, 0.0 }
 0x249   :  { %v287_v58 = vadd.f32 %v286_v50, %v247_v27  ;;  %p520_p5 = por %p519_p4, %p518_p3 }
 0x24b   :  { %v310_v38 = vpop.permute.xlu0 %309  ;;  %v320_v39 = vpop.permute.xlu1 %319  ;;  %p521_p6 = pnand %p520_p5, %p514_p2 }
 0x24c   :  { %vm311_vm15 = vcmp.eq.s32.totalorder %v652_v28, %v310_v38  ;;  %vm321_vm3 = vcmp.eq.s32.totalorder %v652_v28, %v320_v39 }
 0x24f   :  { %v330_v40 = vpop.permute.xlu1 %329  ;;  %v304_v41 = vpop.permute.xlu0 %303 }
 0x250   :  { %v306_v44 = vsel %vm301_vm13, %v304_v41, 0.0  ;;  %vm331_vm2 = vcmp.eq.s32.totalorder %v652_v28, %v330_v40 }
 0x251   :  { %v307_v52 = vadd.f32 %v306_v44, %v267_v46 }
 0x253   :  { %v334_v55 = vpop.permute.xlu0 %333 }
 0x254   :  { %v314_v48 = vpop.permute.xlu1 %313  ;;  %v336_v56 = vsel %vm331_vm2, %v334_v55, 0.0 }
 0x255   :  { %v316_v49 = vsel %vm311_vm15, %v314_v48, 0.0  ;;  %v337_v62 = vadd.f32 %v336_v56, %v297_v59 }
 0x256   :  { %v317_v53 = vadd.f32 %v316_v49, %v277_v47 }
 0x258   :  { %v338_v57 = vadd.f32 %v317_v53, %v307_v52 }
 0x259   :  { %v324_v60 = vpop.permute.xlu1 %323 }
 0x25a   :  { %v326_v61 = vsel %vm321_vm3, %v324_v60, 0.0 }
 0x25b   :  { %v327_v63 = vadd.f32 %v326_v61, %v287_v58 }
 0x25d   :  { %v339_v1 = vadd.f32 %v337_v62, %v327_v63 }
 0x25f   :  { %v340_v2 = vadd.f32 %v339_v1, %v338_v57 }
 0x2b1   :  { %v344_v3 = vpop.permute.xlu1 %343 }
 0x2b2   :  { %v346_v5 = vmul.f32 %v344_v3, %v717_v25 }
 0x2b6   :  { %v349_v4 = vpop.permute.xlu1 %348 }
 0x2b7   :  { %v351_v6 = vmul.f32 %v349_v4, %v340_v2 }
 0x2b9   :  { %v352_v7 = vadd.f32 %v351_v6, %v346_v5 }
 0x2bb   :  { %353 = vst [vmem:[#allocation5] sm:$0xff] %v352_v7 }
 0x2bc   :  { %524 = shalt.err (!%p521_p6)
}
 0x2bd   :  { %s525_s26 = scalar_lea.hbm %s768_s7, 128 }
 0x2be   :  { %p526_p7 = scmp.ne.s32.totalorder %s768_s7, %s525_s26  ;;  %p529_p8 = scmp.lt.u32.totalorder %s525_s26, %s768_s7 }
 0x2c0   :  { %p531_p9 = pnand %p529_p8, %p526_p7 }
 0x2c2   :  { %534 = shalt.err (!%p531_p9)
}
 0x2c3   :  { %366 = dma.vmem_to_hbm [thread:$0]  %s364_s22, 128, %s768_s7, [#allocation4]  }
 0x2c4   :  { %537 = dma.done.wait [#allocation4], 128  }
 0x2c5   :  { %538 = vsyncadd [#allocation4], 4294967168 }
 0x2c6   :  { %539 = dma.done.wait [#allocation7], 128  }
 0x2c7   :  { %540 = vsyncadd [#allocation7], 4294967168 }
 0x2c8   :  { %387 = vsyncpa [#allocation3], 1 }
 0x2c9   :  { %388 = vsyncpa [#allocation4], 1 }
 0x2ca   :  { %389 = vsyncpa [#allocation7], 1 }

</bundles_post_ra>
